<compile_context>
chip_gen: v6e
topology: v6e:2x2x1
jax: 0.10.0
libtpu: 0.0.40
codegen_flags: <defaults>
</compile_context>

<pallas_src>
import functools

import jax
import jax.numpy as jnp
import numpy as np
from jax.experimental import pallas as pl
from jax.experimental.pallas import tpu as pltpu


SLAB_W = 128              # lane width of every slab
N_WBLOCKS = 5             # lin1, lin2, lin3, fused lin4@lin5, lin6
PROW0 = N_WBLOCKS * 128   # first row of the bias/gamma/beta/wc rows


def _round_up(n, m):
    return ((n + m - 1) // m) * m


def comm_kernel(dyn_ref, slab_ref, out_ref, *, B, noise_row0, num_sym, inv_b):
    """dyn_ref : (2*Bp, 128) f32   rows [0, B)            = x  (lane-padded)
                                   rows [noise_row0, +B)  = channel noise
       slab_ref: (PROW0 + 16, 128) f32
                 rows [128*i, 128*(i+1)) = weight block i (K, N zero-padded)
                 row   PROW0 + r         = bias / gamma / beta / wc row r
       out_ref : (B, num_sym) f32
    """

    def wblock(i):                        # (128, 128) zero-padded weight
        return slab_ref[i * 128:(i + 1) * 128, :]

    def prow(r):                          # (1, 128) zero-padded param row
        return slab_ref[PROW0 + r:PROW0 + r + 1, :]

    # Hoist all small loads ahead of the serial matmul/tanh/BN chain.
    b1, b2, b3, bc = prow(0), prow(1), prow(2), prow(3)
    gamma, beta, b45, b6 = prow(4), prow(5), prow(6), prow(7)
    wc0, wc1 = prow(8), prow(9)
    x = dyn_ref[0:B, :]                               # (B, 128)
    noise = dyn_ref[noise_row0:noise_row0 + B, :]     # (B, 128)

    # lin1 + relu, lin2 + relu, lin3 + tanh  (lane-dense f32 MXU matmuls)
    h = jnp.maximum(jnp.dot(x, wblock(0), preferred_element_type=jnp.float32) + b1, 0.0)
    h = jnp.maximum(jnp.dot(h, wblock(1), preferred_element_type=jnp.float32) + b2, 0.0)
    h = jnp.tanh(jnp.dot(h, wblock(2), preferred_element_type=jnp.float32) + b3)

    # lin_c: K=2 contraction on the VPU (two broadcast FMAs, skip the MXU).
    # wc0/wc1/bc are zero beyond nchan2 lanes, so h stays zero there.
    h = h[:, 0:1] * wc0 + h[:, 1:2] * wc1 + bc        # (B, 128)

    # BatchNorm1d, training-mode batch statistics (biased var, eps=1e-5).
    # Zero lanes: mean = var = 0 -> normalized value 0; gamma/beta rows are 0.
    mean = jnp.sum(h, axis=0, keepdims=True) * inv_b
    msq = jnp.sum(h * h, axis=0, keepdims=True) * inv_b
    var = msq - mean * mean
    h = (h - mean) * jax.lax.rsqrt(var + 1e-5)
    h = h * gamma + beta

    # tanh + additive channel noise
    chan = jnp.tanh(h) + noise

    # fused lin4 @ lin5 (+ relu), then lin6
    rec = jnp.maximum(
        jnp.dot(chan, wblock(3), preferred_element_type=jnp.float32) + b45, 0.0)
    rec = jnp.dot(rec, wblock(4), preferred_element_type=jnp.float32) + b6

    out_ref[...] = rec[:, 0:num_sym]


def _pack_param_slab(params):
    """One-time host-side packing of every weight/param into one f32 slab.
    Each weight matrix gets a full zero-padded (128, 128) block so the kernel
    datapath stays lane-dense with no value-level column slices."""
    (w1, b1, w2, b2, w3, b3, wc, bc, gamma, beta,
     w4, b4, w5, b5, w6, b6) = [np.asarray(p, np.float64) for p in params]

    # lin4/lin5 compose exactly: no nonlinearity between them in the forward.
    w45 = w4 @ w5
    b45 = b4 @ w5 + b5

    weights = [w1, w2, w3, w45, w6]
    rows = [b1, b2, b3, bc, gamma, beta, b45, b6, wc[0], wc[1]]
    for w in weights:
        assert w.shape[0] <= 128 and w.shape[1] <= 128

    slab = np.zeros((PROW0 + 16, SLAB_W), np.float32)
    for i, w in enumerate(weights):
        slab[i * 128:i * 128 + w.shape[0], 0:w.shape[1]] = w
    for r, v in enumerate(rows):
        v = np.asarray(v).reshape(-1)
        assert v.shape[0] <= SLAB_W
        slab[PROW0 + r, 0:v.shape[0]] = v
    return jnp.asarray(slab)


def make_comm_4_2_forward(params, batch_size):
    """Builds the cached parameter slab once; returns a jitted forward(x, noise)."""
    wc, w6 = params[6], params[14]
    num_sym = w6.shape[1]
    nchan2 = wc.shape[1]
    B = batch_size
    Bp = _round_up(B, 8)

    slab = _pack_param_slab(params)          # one-time, off the hot path

    kernel = functools.partial(comm_kernel, B=B, noise_row0=Bp,
                               num_sym=num_sym, inv_b=1.0 / B)
    pallas_fn = pl.pallas_call(
        kernel,
        out_shape=jax.ShapeDtypeStruct((B, num_sym), jnp.float32),
        in_specs=[pl.BlockSpec(memory_space=pltpu.MemorySpace.VMEM)] * 2,
        out_specs=pl.BlockSpec(memory_space=pltpu.MemorySpace.VMEM),
    )

    @jax.jit
    def forward(x, noise):
        # Per-call work: pack x + noise into ONE lane-dense slab (fused pads).
        xp = jnp.pad(x.astype(jnp.float32),
                     ((0, Bp - B), (0, SLAB_W - num_sym)))
        np_ = jnp.pad(noise.astype(jnp.float32),
                      ((0, Bp - B), (0, SLAB_W - nchan2)))
        dyn = jnp.concatenate([xp, np_], axis=0)     # (2*Bp, 128)
        return pallas_fn(dyn, slab)

    return forward


def reference_forward(x, params, noise):
    """Pure-JAX f32 reference matching the PyTorch forward (for validation)."""
    (w1, b1, w2, b2, w3, b3, wc, bc, gamma, beta,
     w4, b4, w5, b5, w6, b6) = params
    dot = functools.partial(jnp.dot, precision=jax.lax.Precision.HIGHEST)
    h = jnp.maximum(dot(x, w1) + b1, 0.0)
    h = jnp.maximum(dot(h, w2) + b2, 0.0)
    h = jnp.tanh(dot(h, w3) + b3)
    h = dot(h, wc) + bc
    mean = jnp.mean(h, axis=0, keepdims=True)
    var = jnp.mean((h - mean) ** 2, axis=0, keepdims=True)
    h = (h - mean) * jax.lax.rsqrt(var + 1e-5)
    h = h * gamma + beta
    h = jnp.tanh(h)
    chan = h + noise
    rec = dot(chan, w4) + b4     # original feeds the pre-relu rec_out into lin5
    rec = dot(rec, w5) + b5
    rec = jnp.maximum(rec, 0.0)
    return dot(rec, w6) + b6


def init_linear(key, fan_in, fan_out):
    """PyTorch-default-style uniform init; weight pre-transposed to (in, out)."""
    kw, kb = jax.random.split(key)
    bound = 1.0 / np.sqrt(fan_in)
    w = jax.random.uniform(kw, (fan_in, fan_out), jnp.float32, -bound, bound)
    b = jax.random.uniform(kb, (1, fan_out), jnp.float32, -bound, bound)
    return w, b


if __name__ == "__main__":
    num_sym = 16
    num_chan = 4
    rate = 0.5
    train_snr = 7
    hidden_neurons = 32
    batch = 8

    Ebno = 10.0 ** (train_snr / 10.0)
    std_dev = float(np.sqrt(1.0 / (2.0 * Ebno * rate)))

    key = jax.random.PRNGKey(0)
    keys = jax.random.split(key, 10)

    w1, b1 = init_linear(keys[0], num_sym, num_sym)
    w2, b2 = init_linear(keys[1], num_sym, hidden_neurons)
    w3, b3 = init_linear(keys[2], hidden_neurons, 2)
    wc, bc = init_linear(keys[3], 2, num_chan * 2)
    gamma = jnp.ones((1, num_chan * 2), jnp.float32)   # BatchNorm1d weight init
    beta = jnp.zeros((1, num_chan * 2), jnp.float32)   # BatchNorm1d bias init
    w4, b4 = init_linear(keys[4], num_chan * 2, hidden_neurons)
    w5, b5 = init_linear(keys[5], hidden_neurons, num_sym)
    w6, b6 = init_linear(keys[6], num_sym, num_sym)

    x = jax.random.normal(keys[7], (batch, num_sym), jnp.float32)

    # TODO(synk): Noise_1 is not defined in the source file; assumed semantics
    # are additive zero-mean Gaussian noise with std = std_dev, precomputed here.
    noise = std_dev * jax.random.normal(keys[8], (batch, num_chan * 2), jnp.float32)

    params = [w1, b1, w2, b2, w3, b3, wc, bc, gamma, beta,
              w4, b4, w5, b5, w6, b6]

    # Slabs (incl. lin4@lin5 fusion) built exactly once here, not per call.
    forward = make_comm_4_2_forward(params, batch)

    out = forward(x, noise)
    jax.block_until_ready(out)

    ref = reference_forward(x, params, noise)
    assert out.shape == (batch, num_sym)
    assert out.dtype == jnp.float32
    # f32 matmuls end-to-end; tolerance covers the lin4/lin5 reassociation and
    # the single-pass BatchNorm variance formula.
    np.testing.assert_allclose(np.asarray(out), np.asarray(ref),
                               rtol=2e-2, atol=2e-2)
    print("KERNEL_OK")
</pallas_src>

<mosaic_0001>
module attributes {stable_mosaic.version = 11 : i64} {
  func.func @comm_kernel(%arg0: memref<16x128xf32, #tpu.memory_space<vmem>>, %arg1: memref<656x128xf32, #tpu.memory_space<vmem>>, %arg2: memref<8x16xf32, #tpu.memory_space<vmem>>) attributes {dimension_semantics = [], scalar_prefetch = 0 : i64, scratch_operands = 0 : i64, tpu.core_type = #tpu.core_type<tc>} {
    %c640 = arith.constant 640 : index
    %c0 = arith.constant 0 : index
    %0 = vector.load %arg1[%c640, %c0] : memref<656x128xf32, #tpu.memory_space<vmem>>, vector<1x128xf32>
    %c641 = arith.constant 641 : index
    %c0_0 = arith.constant 0 : index
    %1 = vector.load %arg1[%c641, %c0_0] : memref<656x128xf32, #tpu.memory_space<vmem>>, vector<1x128xf32>
    %c642 = arith.constant 642 : index
    %c0_1 = arith.constant 0 : index
    %2 = vector.load %arg1[%c642, %c0_1] : memref<656x128xf32, #tpu.memory_space<vmem>>, vector<1x128xf32>
    %c643 = arith.constant 643 : index
    %c0_2 = arith.constant 0 : index
    %3 = vector.load %arg1[%c643, %c0_2] : memref<656x128xf32, #tpu.memory_space<vmem>>, vector<1x128xf32>
    %c644 = arith.constant 644 : index
    %c0_3 = arith.constant 0 : index
    %4 = vector.load %arg1[%c644, %c0_3] : memref<656x128xf32, #tpu.memory_space<vmem>>, vector<1x128xf32>
    %c645 = arith.constant 645 : index
    %c0_4 = arith.constant 0 : index
    %5 = vector.load %arg1[%c645, %c0_4] : memref<656x128xf32, #tpu.memory_space<vmem>>, vector<1x128xf32>
    %c646 = arith.constant 646 : index
    %c0_5 = arith.constant 0 : index
    %6 = vector.load %arg1[%c646, %c0_5] : memref<656x128xf32, #tpu.memory_space<vmem>>, vector<1x128xf32>
    %c647 = arith.constant 647 : index
    %c0_6 = arith.constant 0 : index
    %7 = vector.load %arg1[%c647, %c0_6] : memref<656x128xf32, #tpu.memory_space<vmem>>, vector<1x128xf32>
    %c648 = arith.constant 648 : index
    %c0_7 = arith.constant 0 : index
    %8 = vector.load %arg1[%c648, %c0_7] : memref<656x128xf32, #tpu.memory_space<vmem>>, vector<1x128xf32>
    %c649 = arith.constant 649 : index
    %c0_8 = arith.constant 0 : index
    %9 = vector.load %arg1[%c649, %c0_8] : memref<656x128xf32, #tpu.memory_space<vmem>>, vector<1x128xf32>
    %c0_9 = arith.constant 0 : index
    %c0_10 = arith.constant 0 : index
    %10 = vector.load %arg0[%c0_9, %c0_10] : memref<16x128xf32, #tpu.memory_space<vmem>>, vector<8x128xf32>
    %c8 = arith.constant 8 : index
    %c0_11 = arith.constant 0 : index
    %11 = vector.load %arg0[%c8, %c0_11] : memref<16x128xf32, #tpu.memory_space<vmem>>, vector<8x128xf32>
    %c0_12 = arith.constant 0 : index
    %c0_13 = arith.constant 0 : index
    %12 = vector.load %arg1[%c0_12, %c0_13] : memref<656x128xf32, #tpu.memory_space<vmem>>, vector<128x128xf32>
    %cst = arith.constant dense<0.000000e+00> : vector<8x128xf32>
    %13 = tpu.matmul %10, %12, %cst {dimension_numbers = #tpu.dot_dimension_numbers<[1], [0], [0], [1], [0, 0, 1, 1], [], []>} : vector<8x128xf32>, vector<128x128xf32>, vector<8x128xf32> -> vector<8x128xf32>
    %14 = vector.broadcast %0 : vector<1x128xf32> to vector<8x128xf32>
    %15 = arith.addf %13, %14 : vector<8x128xf32>
    %cst_14 = arith.constant 0.000000e+00 : f32
    %16 = vector.broadcast %cst_14 : f32 to vector<8x128xf32>
    %17 = arith.maximumf %15, %16 : vector<8x128xf32>
    %c128 = arith.constant 128 : index
    %c0_15 = arith.constant 0 : index
    %18 = vector.load %arg1[%c128, %c0_15] : memref<656x128xf32, #tpu.memory_space<vmem>>, vector<128x128xf32>
    %cst_16 = arith.constant dense<0.000000e+00> : vector<8x128xf32>
    %19 = tpu.matmul %17, %18, %cst_16 {dimension_numbers = #tpu.dot_dimension_numbers<[1], [0], [0], [1], [0, 0, 1, 1], [], []>} : vector<8x128xf32>, vector<128x128xf32>, vector<8x128xf32> -> vector<8x128xf32>
    %20 = vector.broadcast %1 : vector<1x128xf32> to vector<8x128xf32>
    %21 = arith.addf %19, %20 : vector<8x128xf32>
    %cst_17 = arith.constant 0.000000e+00 : f32
    %22 = vector.broadcast %cst_17 : f32 to vector<8x128xf32>
    %23 = arith.maximumf %21, %22 : vector<8x128xf32>
    %c256 = arith.constant 256 : index
    %c0_18 = arith.constant 0 : index
    %24 = vector.load %arg1[%c256, %c0_18] : memref<656x128xf32, #tpu.memory_space<vmem>>, vector<128x128xf32>
    %cst_19 = arith.constant dense<0.000000e+00> : vector<8x128xf32>
    %25 = tpu.matmul %23, %24, %cst_19 {dimension_numbers = #tpu.dot_dimension_numbers<[1], [0], [0], [1], [0, 0, 1, 1], [], []>} : vector<8x128xf32>, vector<128x128xf32>, vector<8x128xf32> -> vector<8x128xf32>
    %26 = vector.broadcast %2 : vector<1x128xf32> to vector<8x128xf32>
    %27 = arith.addf %25, %26 : vector<8x128xf32>
    %28 = math.tanh %27 : vector<8x128xf32>
    %29 = vector.extract_strided_slice %28 {offsets = [0, 0], sizes = [8, 1], strides = [1, 1]} : vector<8x128xf32> to vector<8x1xf32>
    %30 = vector.broadcast %29 : vector<8x1xf32> to vector<8x128xf32>
    %31 = vector.broadcast %8 : vector<1x128xf32> to vector<8x128xf32>
    %32 = arith.mulf %30, %31 : vector<8x128xf32>
    %33 = vector.extract_strided_slice %28 {offsets = [0, 1], sizes = [8, 1], strides = [1, 1]} : vector<8x128xf32> to vector<8x1xf32>
    %34 = vector.broadcast %33 : vector<8x1xf32> to vector<8x128xf32>
    %35 = vector.broadcast %9 : vector<1x128xf32> to vector<8x128xf32>
    %36 = arith.mulf %34, %35 : vector<8x128xf32>
    %37 = arith.addf %32, %36 : vector<8x128xf32>
    %38 = vector.broadcast %3 : vector<1x128xf32> to vector<8x128xf32>
    %39 = arith.addf %37, %38 : vector<8x128xf32>
    %cst_20 = arith.constant dense<0.000000e+00> : vector<128xf32>
    %40 = vector.multi_reduction <add>, %39, %cst_20 [0] : vector<8x128xf32> to vector<128xf32>
    %41 = vector.shape_cast %40 : vector<128xf32> to vector<1x128xf32>
    %cst_21 = arith.constant 1.250000e-01 : f32
    %42 = vector.broadcast %cst_21 : f32 to vector<1x128xf32>
    %43 = arith.mulf %41, %42 : vector<1x128xf32>
    %44 = arith.mulf %39, %39 : vector<8x128xf32>
    %cst_22 = arith.constant dense<0.000000e+00> : vector<128xf32>
    %45 = vector.multi_reduction <add>, %44, %cst_22 [0] : vector<8x128xf32> to vector<128xf32>
    %46 = vector.shape_cast %45 : vector<128xf32> to vector<1x128xf32>
    %cst_23 = arith.constant 1.250000e-01 : f32
    %47 = vector.broadcast %cst_23 : f32 to vector<1x128xf32>
    %48 = arith.mulf %46, %47 : vector<1x128xf32>
    %49 = arith.mulf %43, %43 : vector<1x128xf32>
    %50 = arith.subf %48, %49 : vector<1x128xf32>
    %51 = vector.broadcast %43 : vector<1x128xf32> to vector<8x128xf32>
    %52 = arith.subf %39, %51 : vector<8x128xf32>
    %cst_24 = arith.constant 9.99999974E-6 : f32
    %53 = vector.broadcast %cst_24 : f32 to vector<1x128xf32>
    %54 = arith.addf %50, %53 : vector<1x128xf32>
    %55 = math.rsqrt %54 : vector<1x128xf32>
    %56 = vector.broadcast %55 : vector<1x128xf32> to vector<8x128xf32>
    %57 = arith.mulf %52, %56 : vector<8x128xf32>
    %58 = vector.broadcast %4 : vector<1x128xf32> to vector<8x128xf32>
    %59 = arith.mulf %57, %58 : vector<8x128xf32>
    %60 = vector.broadcast %5 : vector<1x128xf32> to vector<8x128xf32>
    %61 = arith.addf %59, %60 : vector<8x128xf32>
    %62 = math.tanh %61 : vector<8x128xf32>
    %63 = arith.addf %62, %11 : vector<8x128xf32>
    %c384 = arith.constant 384 : index
    %c0_25 = arith.constant 0 : index
    %64 = vector.load %arg1[%c384, %c0_25] : memref<656x128xf32, #tpu.memory_space<vmem>>, vector<128x128xf32>
    %cst_26 = arith.constant dense<0.000000e+00> : vector<8x128xf32>
    %65 = tpu.matmul %63, %64, %cst_26 {dimension_numbers = #tpu.dot_dimension_numbers<[1], [0], [0], [1], [0, 0, 1, 1], [], []>} : vector<8x128xf32>, vector<128x128xf32>, vector<8x128xf32> -> vector<8x128xf32>
    %66 = vector.broadcast %6 : vector<1x128xf32> to vector<8x128xf32>
    %67 = arith.addf %65, %66 : vector<8x128xf32>
    %cst_27 = arith.constant 0.000000e+00 : f32
    %68 = vector.broadcast %cst_27 : f32 to vector<8x128xf32>
    %69 = arith.maximumf %67, %68 : vector<8x128xf32>
    %c512 = arith.constant 512 : index
    %c0_28 = arith.constant 0 : index
    %70 = vector.load %arg1[%c512, %c0_28] : memref<656x128xf32, #tpu.memory_space<vmem>>, vector<128x128xf32>
    %cst_29 = arith.constant dense<0.000000e+00> : vector<8x128xf32>
    %71 = tpu.matmul %69, %70, %cst_29 {dimension_numbers = #tpu.dot_dimension_numbers<[1], [0], [0], [1], [0, 0, 1, 1], [], []>} : vector<8x128xf32>, vector<128x128xf32>, vector<8x128xf32> -> vector<8x128xf32>
    %72 = vector.broadcast %7 : vector<1x128xf32> to vector<8x128xf32>
    %73 = arith.addf %71, %72 : vector<8x128xf32>
    %74 = vector.extract_strided_slice %73 {offsets = [0, 0], sizes = [8, 16], strides = [1, 1]} : vector<8x128xf32> to vector<8x16xf32>
    %c0_30 = arith.constant 0 : index
    %c0_31 = arith.constant 0 : index
    %75 = vector.load %arg2[%c0_30, %c0_31] : memref<8x16xf32, #tpu.memory_space<vmem>>, vector<8x16xf32>
    tpu.vector_store %arg2[%c0_30, %c0_31], %74 {strides = array<i32>} : memref<8x16xf32, #tpu.memory_space<vmem>>, vector<8x16xf32>,
    return
  }
}

</mosaic_0001>

<bundles_post_ra>
// kernel: forward.1
= control target key start
LH: loop header
LB: loop body
LE: loop exit
PB: predicated region body
PF: predicated region fallthrough
CT: control target
= control target key end

     0   :  { %7 = vsyncpa [#allocation3], 0  ;;  %s1022_s0 = inlined_call_operand.vmem [shape: f32[16,128], index: 0, kind: input, shape index: {}]   ;;  %s1023_s1 = inlined_call_operand.hbm [shape: f32[656,128], index: 1, kind: input, shape index: {}]   ;;  %s1024_s2 = inlined_call_operand.hbm [shape: f32[8,16], index: 2, kind: output, shape index: {}]  }
   0x1   :  { %8 = vsyncpa [#allocation4], 0  ;;  %s897_s9 = smov [#allocation2]  }
   0x2   :  { %s16_s10 = sshll.u32 %s897_s9, 4  ;;  %s17_s10 = int_to_ptr.vmem [resolvable:$true] %s16_s10 }
   0x3   :  { %s861_s11 = scalar_lea.vmem %s17_s10, 10496  ;;  %p866_p1 = scmp.lt.s32.totalorder %s17_s10, %s17_s10 }
   0x4   :  { %p862_p0 = scmp.ne.s32.totalorder %s17_s10, %s861_s11  ;;  %p867_p2 = scmp.lt.s32.totalorder %s861_s11, %s861_s11 }
   0x6   :  { %p868_p3 = por %p867_p2, %p866_p1 }
   0x8   :  { %p869_p4 = pnand %p868_p3, %p862_p0 }
   0xa   :  { %872 = shalt.err (!%p869_p4)
}
   0xb   :  { %s898_s12 = smov 128   ;;  %s899_s13 = smov 8  }
   0xc   :  { %22 = dma.hbm_to_vmem [thread:$0]  %s1023_s1, 10496, %s17_s10, [#allocation3], %s898_s12, %s898_s12, %s899_s13  }
   0xd   :  { %893 = dma.done.wait [#allocation3], 10496  }
   0xe   :  { %894 = vsyncadd [#allocation3], 4294956800  ;;  %v900_v0 = vmov 0.0   ;;  %vm901_vm0 = vmmov 0   ;;  %v53_v1 = vld [vmem:[#allocation2 + $0x78] sm:$0xff]  ;;  %v52_v2 = vld [vmem:[#allocation2 + $0x70] sm:$0xff] }
   0xf   :  { %662 = vmatprep.subr.mxu0 %v900_v0  ;;  %694 = vmatprep.mubr.msk.f32.mxu0 %vm901_vm0, %v900_v0  ;;  %v51_v3 = vld [vmem:[#allocation2 + $0x68] sm:$0xff]  ;;  %v50_v4 = vld [vmem:[#allocation2 + $0x60] sm:$0xff]  ;;  %v144_v5 = vld [vmem:[#allocation2 + $0xf8] sm:$0xff]  ;;  %v902_v60 = vmov 0   ;;  %vm550_vm1 = vcmask 130048  }
  0x10   :  { %697 = vmatprep.subr.mxu1 %v900_v0  ;;  %729 = vmatprep.mubr.msk.f32.mxu1 %vm901_vm0, %v900_v0  ;;  %v49_v6 = vld [vmem:[#allocation2 + $0x58] sm:$0xff]  ;;  %v143_v7 = vld [vmem:[#allocation2 + $0xf0] sm:$0xff]  ;;  %v142_v8 = vld [vmem:[#allocation2 + $0xe8] sm:$0xff] }
  0x11   :  { %663 = vmatpush3.msra.mxu0 %v53_v1  ;;  %698 = vmatpush3.msra.mxu1 %v144_v5  ;;  %v48_v9 = vld [vmem:[#allocation2 + $0x50] sm:$0xff]  ;;  %v141_v10 = vld [vmem:[#allocation2 + $0xe0] sm:$0xff]  ;;  %v47_v11 = vld [vmem:[#allocation2 + $0x48] sm:$0xff] }
  0x12   :  { %664 = vmatprep.subr.mxu0 %v900_v0  ;;  %699 = vmatprep.subr.mxu1 %v900_v0  ;;  %v140_v12 = vld [vmem:[#allocation2 + $0xd8] sm:$0xff]  ;;  %v46_v13 = vld [vmem:[#allocation2 + $0x40] sm:$0xff]  ;;  %v139_v14 = vld [vmem:[#allocation2 + $0xd0] sm:$0xff] }
  0x13   :  { %665 = vmatpush3.msra.mxu0 %v52_v2  ;;  %700 = vmatpush3.msra.mxu1 %v143_v7  ;;  %v45_v15 = vld [vmem:[#allocation2 + $0x38] sm:$0xff]  ;;  %v138_v16 = vld [vmem:[#allocation2 + $0xc8] sm:$0xff]  ;;  %v44_v17 = vld [vmem:[#allocation2 + $0x30] sm:$0xff] }
  0x14   :  { %666 = vmatprep.subr.mxu0 %v900_v0  ;;  %701 = vmatprep.subr.mxu1 %v900_v0  ;;  %v137_v18 = vld [vmem:[#allocation2 + $0xc0] sm:$0xff]  ;;  %v43_v19 = vld [vmem:[#allocation2 + $0x28] sm:$0xff]  ;;  %v136_v20 = vld [vmem:[#allocation2 + $0xb8] sm:$0xff] }
  0x15   :  { %667 = vmatpush3.msra.mxu0 %v51_v3  ;;  %702 = vmatpush3.msra.mxu1 %v142_v8  ;;  %v42_v21 = vld [vmem:[#allocation2 + $0x20] sm:$0xff]  ;;  %v135_v22 = vld [vmem:[#allocation2 + $0xb0] sm:$0xff]  ;;  %v41_v23 = vld [vmem:[#allocation2 + $0x18] sm:$0xff]  ;;  %v903_v3 = vmov 1  }
  0x16   :  { %668 = vmatprep.subr.mxu0 %v900_v0  ;;  %703 = vmatprep.subr.mxu1 %v900_v0  ;;  %v134_v24 = vld [vmem:[#allocation2 + $0xa8] sm:$0xff]  ;;  %v40_v25 = vld [vmem:[#allocation2 + $0x10] sm:$0xff]  ;;  %v133_v26 = vld [vmem:[#allocation2 + $0xa0] sm:$0xff] }
  0x17   :  { %669 = vmatpush3.msra.mxu0 %v50_v4  ;;  %704 = vmatpush3.msra.mxu1 %v141_v10  ;;  %v39_v27 = vld [vmem:[#allocation2 + $0x8] sm:$0xff]  ;;  %v132_v28 = vld [vmem:[#allocation2 + $0x98] sm:$0xff]  ;;  %v38_v29 = vld [vmem:[#allocation2] sm:$0xff] }
  0x18   :  { %670 = vmatprep.subr.mxu0 %v900_v0  ;;  %705 = vmatprep.subr.mxu1 %v900_v0  ;;  %v36_v30 = vld [vmem:[%s1022_s0] sm:$0xff]  ;;  %v131_v31 = vld [vmem:[#allocation2 + $0x90] sm:$0xff]  ;;  %v130_v32 = vld [vmem:[#allocation2 + $0x88] sm:$0xff] }
  0x19   :  { %671 = vmatpush3.msra.mxu0 %v49_v6  ;;  %706 = vmatpush3.msra.mxu1 %v140_v12  ;;  %v129_v33 = vld [vmem:[#allocation2 + $0x80] sm:$0xff]  ;;  %v235_v34 = vld [vmem:[#allocation2 + $0x178] sm:$0xff]  ;;  %v234_v35 = vld [vmem:[#allocation2 + $0x170] sm:$0xff] }
  0x1a   :  { %672 = vmatprep.subr.mxu0 %v900_v0  ;;  %707 = vmatprep.subr.mxu1 %v900_v0  ;;  %v233_v36 = vld [vmem:[#allocation2 + $0x168] sm:$0xff]  ;;  %v232_v37 = vld [vmem:[#allocation2 + $0x160] sm:$0xff]  ;;  %v231_v38 = vld [vmem:[#allocation2 + $0x158] sm:$0xff] }
  0x1b   :  { %673 = vmatpush3.msra.mxu0 %v48_v9  ;;  %708 = vmatpush3.msra.mxu1 %v139_v14  ;;  %v230_v39 = vld [vmem:[#allocation2 + $0x150] sm:$0xff]  ;;  %v229_v40 = vld [vmem:[#allocation2 + $0x148] sm:$0xff]  ;;  %v228_v41 = vld [vmem:[#allocation2 + $0x140] sm:$0xff] }
  0x1c   :  { %674 = vmatprep.subr.mxu0 %v900_v0  ;;  %709 = vmatprep.subr.mxu1 %v900_v0  ;;  %v227_v42 = vld [vmem:[#allocation2 + $0x138] sm:$0xff]  ;;  %v226_v43 = vld [vmem:[#allocation2 + $0x130] sm:$0xff]  ;;  %v225_v44 = vld [vmem:[#allocation2 + $0x128] sm:$0xff] }
  0x1d   :  { %675 = vmatpush3.msra.mxu0 %v47_v11  ;;  %710 = vmatpush3.msra.mxu1 %v138_v16  ;;  %v224_v45 = vld [vmem:[#allocation2 + $0x120] sm:$0xff]  ;;  %v223_v46 = vld [vmem:[#allocation2 + $0x118] sm:$0xff]  ;;  %v222_v52 = vld [vmem:[#allocation2 + $0x110] sm:$0xff] }
  0x1e   :  { %676 = vmatprep.subr.mxu0 %v900_v0  ;;  %711 = vmatprep.subr.mxu1 %v900_v0  ;;  %v567_v47 = vld [vmem:[#allocation2 + $0x280] ss:$0 sm:$0xff]  ;;  %v221_v53 = vld [vmem:[#allocation2 + $0x108] sm:$0xff]  ;;  %v568_v55 = vld [vmem:[#allocation2 + $0x281] ss:$0 sm:$0xff] }
  0x1f   :  { %677 = vmatpush3.msra.mxu0 %v46_v13  ;;  %712 = vmatpush3.msra.mxu1 %v137_v18  ;;  %v220_v54 = vld [vmem:[#allocation2 + $0x100] sm:$0xff]  ;;  %v384_v4 = vld [vmem:[#allocation2 + $0x1f8] sm:$0xff]  ;;  %v383_v5 = vld [vmem:[#allocation2 + $0x1f0] sm:$0xff] }
  0x20   :  { %678 = vmatprep.subr.mxu0 %v900_v0  ;;  %713 = vmatprep.subr.mxu1 %v900_v0  ;;  %v569_v61 = vld [vmem:[#allocation2 + $0x282] ss:$0 sm:$0xff]  ;;  %v382_v6 = vld [vmem:[#allocation2 + $0x1e8] sm:$0xff]  ;;  %v380_v8 = vld [vmem:[#allocation2 + $0x1d8] sm:$0xff] }
  0x21   :  { %679 = vmatpush3.msra.mxu0 %v45_v15  ;;  %714 = vmatpush3.msra.mxu1 %v136_v20  ;;  %v381_v7 = vld [vmem:[#allocation2 + $0x1e0] sm:$0xff]  ;;  %v379_v9 = vld [vmem:[#allocation2 + $0x1d0] sm:$0xff]  ;;  %v378_v10 = vld [vmem:[#allocation2 + $0x1c8] sm:$0xff] }
  0x22   :  { %680 = vmatprep.subr.mxu0 %v900_v0  ;;  %715 = vmatprep.subr.mxu1 %v900_v0  ;;  %v377_v11 = vld [vmem:[#allocation2 + $0x1c0] sm:$0xff]  ;;  %v376_v12 = vld [vmem:[#allocation2 + $0x1b8] sm:$0xff]  ;;  %v375_v13 = vld [vmem:[#allocation2 + $0x1b0] sm:$0xff] }
  0x23   :  { %681 = vmatpush3.msra.mxu0 %v44_v17  ;;  %716 = vmatpush3.msra.mxu1 %v135_v22  ;;  %v374_v14 = vld [vmem:[#allocation2 + $0x1a8] sm:$0xff]  ;;  %v373_v15 = vld [vmem:[#allocation2 + $0x1a0] sm:$0xff]  ;;  %v372_v16 = vld [vmem:[#allocation2 + $0x198] sm:$0xff] }
  0x24   :  { %682 = vmatprep.subr.mxu0 %v900_v0  ;;  %717 = vmatprep.subr.mxu1 %v900_v0  ;;  %v371_v17 = vld [vmem:[#allocation2 + $0x190] sm:$0xff]  ;;  %v370_v18 = vld [vmem:[#allocation2 + $0x188] sm:$0xff]  ;;  %v475_v20 = vld [vmem:[#allocation2 + $0x278] sm:$0xff] }
  0x25   :  { %683 = vmatpush3.msra.mxu0 %v43_v19  ;;  %718 = vmatpush3.msra.mxu1 %v134_v24  ;;  %v369_v19 = vld [vmem:[#allocation2 + $0x180] sm:$0xff]  ;;  %v473_v22 = vld [vmem:[#allocation2 + $0x268] sm:$0xff]  ;;  %v471_v24 = vld [vmem:[#allocation2 + $0x258] sm:$0xff] }
  0x26   :  { %684 = vmatprep.subr.mxu0 %v900_v0  ;;  %719 = vmatprep.subr.mxu1 %v900_v0 }
  0x27   :  { %685 = vmatpush3.msra.mxu0 %v42_v21  ;;  %720 = vmatpush3.msra.mxu1 %v133_v26  ;;  %v474_v21 = vld [vmem:[#allocation2 + $0x270] sm:$0xff]  ;;  %v469_v26 = vld [vmem:[#allocation2 + $0x248] sm:$0xff] }
  0x28   :  { %686 = vmatprep.subr.mxu0 %v900_v0  ;;  %721 = vmatprep.subr.mxu1 %v900_v0 }
  0x29   :  { %687 = vmatpush3.msra.mxu0 %v41_v23  ;;  %722 = vmatpush3.msra.mxu1 %v132_v28  ;;  %v472_v23 = vld [vmem:[#allocation2 + $0x260] sm:$0xff]  ;;  %v467_v28 = vld [vmem:[#allocation2 + $0x238] sm:$0xff] }
  0x2a   :  { %688 = vmatprep.subr.mxu0 %v900_v0  ;;  %723 = vmatprep.subr.mxu1 %v900_v0 }
  0x2b   :  { %689 = vmatpush3.msra.mxu0 %v40_v25  ;;  %724 = vmatpush3.msra.mxu1 %v131_v31  ;;  %v470_v25 = vld [vmem:[#allocation2 + $0x250] sm:$0xff]  ;;  %v464_v31 = vld [vmem:[#allocation2 + $0x220] sm:$0xff] }
  0x2c   :  { %690 = vmatprep.subr.mxu0 %v900_v0  ;;  %725 = vmatprep.subr.mxu1 %v900_v0 }
  0x2d   :  { %691 = vmatpush3.msra.mxu0 %v39_v27  ;;  %726 = vmatpush3.msra.mxu1 %v130_v32  ;;  %v468_v27 = vld [vmem:[#allocation2 + $0x240] sm:$0xff]  ;;  %v463_v32 = vld [vmem:[#allocation2 + $0x218] sm:$0xff] }
  0x2e   :  { %692 = vmatprep.subr.mxu0 %v900_v0  ;;  %727 = vmatprep.subr.mxu1 %v900_v0 }
  0x2f   :  { %693 = vmatpush3.msra.mxu0 %v38_v29  ;;  %728 = vmatpush3.msra.mxu1 %v129_v33  ;;  %v466_v29 = vld [vmem:[#allocation2 + $0x230] sm:$0xff] }
  0x30   :  { %695 = vmatmul.mubr.f32.vlgmr.msra.gmra.mxu0 %v36_v30  ;;  %732 = vmatprep.subr.mxu0 %v900_v0  ;;  %v465_v30 = vld [vmem:[#allocation2 + $0x228] sm:$0xff] }
  0x31   :  { %764 = vmatprep.mubr.msk.f32.mxu0 %vm901_vm0, %v900_v0  ;;  %767 = vmatprep.subr.mxu1 %v900_v0 }
  0x32   :  { %733 = vmatpush3.msra.mxu0 %v235_v34  ;;  %845 = vset.pattern.permute.xlu0 %v902_v60  ;;  %v570_v34 = vld [vmem:[#allocation2 + $0x288] ss:$0 sm:$0xff] }
  0x33   :  { %734 = vmatprep.subr.mxu0 %v900_v0 }
  0x34   :  { %735 = vmatpush3.msra.mxu0 %v234_v35  ;;  %v571_v35 = vld [vmem:[#allocation2 + $0x289] ss:$0 sm:$0xff] }
  0x35   :  { %736 = vmatprep.subr.mxu0 %v900_v0 }
  0x36   :  { %737 = vmatpush3.msra.mxu0 %v233_v36 }
  0x37   :  { %738 = vmatprep.subr.mxu0 %v900_v0 }
  0x38   :  { %739 = vmatpush3.msra.mxu0 %v232_v37 }
  0x39   :  { %740 = vmatprep.subr.mxu0 %v900_v0 }
  0x3a   :  { %741 = vmatpush3.msra.mxu0 %v231_v38 }
  0x3b   :  { %742 = vmatprep.subr.mxu0 %v900_v0 }
  0x3c   :  { %743 = vmatpush3.msra.mxu0 %v230_v39  ;;  %v572_v39 = vld [vmem:[#allocation2 + $0x283] ss:$0 sm:$0xff] }
  0x3d   :  { %744 = vmatprep.subr.mxu0 %v900_v0 }
  0x3e   :  { %745 = vmatpush3.msra.mxu0 %v229_v40 }
  0x3f   :  { %746 = vmatprep.subr.mxu0 %v900_v0 }
  0x40   :  { %747 = vmatpush3.msra.mxu0 %v228_v41 }
  0x41   :  { %748 = vmatprep.subr.mxu0 %v900_v0 }
  0x42   :  { %749 = vmatpush3.msra.mxu0 %v227_v42 }
  0x43   :  { %750 = vmatprep.subr.mxu0 %v900_v0 }
  0x44   :  { %751 = vmatpush3.msra.mxu0 %v226_v43 }
  0x45   :  { %752 = vmatprep.subr.mxu0 %v900_v0 }
  0x46   :  { %753 = vmatpush3.msra.mxu0 %v225_v44 }
  0x47   :  { %754 = vmatprep.subr.mxu0 %v900_v0 }
  0x48   :  { %755 = vmatpush3.msra.mxu0 %v224_v45 }
  0x49   :  { %756 = vmatprep.subr.mxu0 %v900_v0 }
  0x4a   :  { %757 = vmatpush3.msra.mxu0 %v223_v46 }
  0x4b   :  { %758 = vmatprep.subr.mxu0 %v900_v0 }
  0x4c   :  { %759 = vmatpush3.msra.mxu0 %v222_v52 }
  0x4d   :  { %760 = vmatprep.subr.mxu0 %v900_v0 }
  0x4e   :  { %761 = vmatpush3.msra.mxu0 %v221_v53 }
  0x4f   :  { %762 = vmatprep.subr.mxu0 %v900_v0 }
  0x50   :  { %763 = vmatpush3.msra.mxu0 %v220_v54 }
  0x51   :  { %802 = vmatprep.subr.mxu0 %v900_v0 }
  0xf0   :  { %v124_v48 = vpop.f32.mrf.mxu0 }
  0xf1   :  { %v125_v49 = vadd.f32 %v567_v47, %v124_v48 }
  0xf2   :  { %v696_v50 = vpop.f32.mrf.mxu0 }
  0xf3   :  { %v128_v51 = vmax.f32 %v125_v49, 0.0 }
  0xf5   :  { %730 = vmatmul.mubr.f32.vlgmr.msra.gmra.mxu1 %v128_v51 }
  0xf6   :  { %799 = vmatprep.mubr.msk.f32.mxu1 %vm901_vm0, %v900_v0  ;;  %768 = vmatpush3.msra.mxu1 %v384_v4  ;;  %v37_v4 = vld [vmem:[%s1022_s0 + $0x8] sm:$0xff]  ;;  %s904_s0 = smov [#allocation5]  }
  0xf7   :  { %769 = vmatprep.subr.mxu1 %v900_v0  ;;  %s558_s19 = sshll.u32 %s904_s0, 4  ;;  %s559_s19 = int_to_ptr.vmem [resolvable:$true] %s558_s19 }
  0xf8   :  { %770 = vmatpush3.msra.mxu1 %v383_v5  ;;  %s873_s20 = scalar_lea.vmem %s559_s19, 128  ;;  %p878_p6 = scmp.lt.s32.totalorder %s559_s19, %s559_s19 }
  0xf9   :  { %771 = vmatprep.subr.mxu1 %v900_v0  ;;  %p874_p5 = scmp.ne.s32.totalorder %s559_s19, %s873_s20  ;;  %p879_p7 = scmp.lt.s32.totalorder %s873_s20, %s873_s20 }
  0xfa   :  { %772 = vmatpush3.msra.mxu1 %v382_v6 }
  0xfb   :  { %773 = vmatprep.subr.mxu1 %v900_v0  ;;  %p880_p8 = por %p879_p7, %p878_p6 }
  0xfc   :  { %774 = vmatpush3.msra.mxu1 %v381_v7  ;;  %v462_v7 = vld [vmem:[#allocation2 + $0x210] sm:$0xff] }
  0xfd   :  { %775 = vmatprep.subr.mxu1 %v900_v0  ;;  %p881_p9 = pnand %p880_p8, %p874_p5 }
  0xfe   :  { %776 = vmatpush3.msra.mxu1 %v380_v8  ;;  %v461_v8 = vld [vmem:[#allocation2 + $0x208] sm:$0xff] }
  0xff   :  { %777 = vmatprep.subr.mxu1 %v900_v0 }
 0x100   :  { %778 = vmatpush3.msra.mxu1 %v379_v9  ;;  %v460_v9 = vld [vmem:[#allocation2 + $0x200] sm:$0xff] }
 0x101   :  { %779 = vmatprep.subr.mxu1 %v900_v0 }
 0x102   :  { %780 = vmatpush3.msra.mxu1 %v378_v10  ;;  %v575_v10 = vld [vmem:[#allocation2 + $0x286] ss:$0 sm:$0xff] }
 0x103   :  { %781 = vmatprep.subr.mxu1 %v900_v0 }
 0x104   :  { %782 = vmatpush3.msra.mxu1 %v377_v11 }
 0x105   :  { %783 = vmatprep.subr.mxu1 %v900_v0 }
 0x106   :  { %784 = vmatpush3.msra.mxu1 %v376_v12 }
 0x107   :  { %785 = vmatprep.subr.mxu1 %v900_v0 }
 0x108   :  { %786 = vmatpush3.msra.mxu1 %v375_v13 }
 0x109   :  { %787 = vmatprep.subr.mxu1 %v900_v0 }
 0x10a   :  { %788 = vmatpush3.msra.mxu1 %v374_v14 }
 0x10b   :  { %789 = vmatprep.subr.mxu1 %v900_v0 }
 0x10c   :  { %790 = vmatpush3.msra.mxu1 %v373_v15  ;;  %v576_v15 = vld [vmem:[#allocation2 + $0x287] ss:$0 sm:$0xff] }
 0x10d   :  { %791 = vmatprep.subr.mxu1 %v900_v0 }
 0x10e   :  { %792 = vmatpush3.msra.mxu1 %v372_v16 }
 0x10f   :  { %793 = vmatprep.subr.mxu1 %v900_v0 }
 0x110   :  { %794 = vmatpush3.msra.mxu1 %v371_v17 }
 0x111   :  { %795 = vmatprep.subr.mxu1 %v900_v0 }
 0x112   :  { %796 = vmatpush3.msra.mxu1 %v370_v18 }
 0x113   :  { %797 = vmatprep.subr.mxu1 %v900_v0 }
 0x114   :  { %798 = vmatpush3.msra.mxu1 %v369_v19 }
 0x1b5   :  { %v215_v56 = vpop.f32.mrf.mxu1 }
 0x1b6   :  { %v216_v57 = vadd.f32 %v568_v55, %v215_v56 }
 0x1b7   :  { %v731_v58 = vpop.f32.mrf.mxu1 }
 0x1b8   :  { %v219_v59 = vmax.f32 %v216_v57, 0.0 }
 0x1ba   :  { %765 = vmatmul.mubr.f32.vlgmr.msra.gmra.mxu0 %v219_v59 }
 0x1bb   :  { %834 = vmatprep.mubr.msk.f32.mxu0 %vm901_vm0, %v900_v0  ;;  %803 = vmatpush3.msra.mxu0 %v475_v20 }
 0x1bc   :  { %804 = vmatprep.subr.mxu0 %v900_v0 }
 0x1bd   :  { %805 = vmatpush3.msra.mxu0 %v474_v21 }
 0x1be   :  { %806 = vmatprep.subr.mxu0 %v900_v0 }
 0x1bf   :  { %807 = vmatpush3.msra.mxu0 %v473_v22 }
 0x1c0   :  { %808 = vmatprep.subr.mxu0 %v900_v0 }
 0x1c1   :  { %809 = vmatpush3.msra.mxu0 %v472_v23 }
 0x1c2   :  { %810 = vmatprep.subr.mxu0 %v900_v0 }
 0x1c3   :  { %811 = vmatpush3.msra.mxu0 %v471_v24 }
 0x1c4   :  { %812 = vmatprep.subr.mxu0 %v900_v0 }
 0x1c5   :  { %813 = vmatpush3.msra.mxu0 %v470_v25 }
 0x1c6   :  { %814 = vmatprep.subr.mxu0 %v900_v0 }
 0x1c7   :  { %815 = vmatpush3.msra.mxu0 %v469_v26 }
 0x1c8   :  { %816 = vmatprep.subr.mxu0 %v900_v0 }
 0x1c9   :  { %817 = vmatpush3.msra.mxu0 %v468_v27 }
 0x1ca   :  { %818 = vmatprep.subr.mxu0 %v900_v0 }
 0x1cb   :  { %819 = vmatpush3.msra.mxu0 %v467_v28 }
 0x1cc   :  { %820 = vmatprep.subr.mxu0 %v900_v0 }
 0x1cd   :  { %821 = vmatpush3.msra.mxu0 %v466_v29 }
 0x1ce   :  { %822 = vmatprep.subr.mxu0 %v900_v0 }
 0x1cf   :  { %823 = vmatpush3.msra.mxu0 %v465_v30 }
 0x1d0   :  { %824 = vmatprep.subr.mxu0 %v900_v0 }
 0x1d1   :  { %825 = vmatpush3.msra.mxu0 %v464_v31 }
 0x1d2   :  { %826 = vmatprep.subr.mxu0 %v900_v0 }
 0x1d3   :  { %827 = vmatpush3.msra.mxu0 %v463_v32 }
 0x1d4   :  { %828 = vmatprep.subr.mxu0 %v900_v0 }
 0x1d5   :  { %829 = vmatpush3.msra.mxu0 %v462_v7 }
 0x1d6   :  { %830 = vmatprep.subr.mxu0 %v900_v0 }
 0x1d7   :  { %831 = vmatpush3.msra.mxu0 %v461_v8 }
 0x1d8   :  { %832 = vmatprep.subr.mxu0 %v900_v0 }
 0x1d9   :  { %833 = vmatpush3.msra.mxu0 %v460_v9 }
 0x27a   :  { %v306_v62 = vpop.f32.mrf.mxu0 }
 0x27b   :  { %v307_v63 = vadd.f32 %v569_v61, %v306_v62  ;;  %v573_v62 = vld [vmem:[#allocation2 + $0x284] ss:$0 sm:$0xff] }
 0x27c   :  { %v766_v1 = vpop.f32.mrf.mxu0 }
 0x27d   :  { %847 = vtanh.f32 %v307_v63  ;;  %v574_v1 = vld [vmem:[#allocation2 + $0x285] ss:$0 sm:$0xff] }
 0x28a   :  { %v848_v2 = vpop.eup %847 }
 0x28b   :  { %313 = vperm.xlu0 %845, %v848_v2  }
 0x28f   :  { %846 = vset.pattern.permute.xlu0 %v903_v3 }
 0x290   :  { %322 = vperm.xlu0 %846, %v848_v2  }
 0x306   :  { %v314_v33 = vpop.permute.xlu0 %313 }
 0x307   :  { %v320_v37 = vmul.f32 %v570_v34, %v314_v33 }
 0x30b   :  { %v323_v36 = vpop.permute.xlu0 %322 }
 0x30c   :  { %v329_v38 = vmul.f32 %v571_v35, %v323_v36 }
 0x30e   :  { %v330_v40 = vadd.f32 %v329_v38, %v320_v37 }
 0x310   :  { %v335_v41 = vadd.f32 %v572_v39, %v330_v40 }
 0x312   :  { %v336_v42 = vrot.slane %v335_v41, 4  ;;  %v343_v43 = vmul.f32 %v335_v41, %v335_v41 }
 0x314   :  { %v337_v44 = vadd.f32 %v336_v42, %v335_v41  ;;  %v344_v45 = vrot.slane %v343_v43, 4 }
 0x316   :  { %v338_v46 = vrot.slane %v337_v44, 2  ;;  %v345_v47 = vadd.f32 %v344_v45, %v343_v43 }
 0x318   :  { %v339_v48 = vadd.f32 %v338_v46, %v337_v44  ;;  %v346_v49 = vrot.slane %v345_v47, 2 }
 0x31a   :  { %v340_v50 = vrot.slane %v339_v48, 1  ;;  %v347_v51 = vadd.f32 %v346_v49, %v345_v47 }
 0x31c   :  { %v341_v52 = vadd.f32 %v340_v50, %v339_v48  ;;  %v348_v53 = vrot.slane %v347_v51, 1 }
 0x31e   :  { %v342_v54 = vmul.f32 0.125, %v341_v52  ;;  %v349_v55 = vadd.f32 %v348_v53, %v347_v51 }
 0x320   :  { %v350_v56 = vmul.f32 0.125, %v349_v55  ;;  %v351_v57 = vmul.f32 %v342_v54, %v342_v54  ;;  %v353_v60 = vsub.f32 %v335_v41, %v342_v54 }
 0x322   :  { %v352_v58 = vsub.f32 %v350_v56, %v351_v57 }
 0x324   :  { %v354_v59 = vadd.f32 1e-05, %v352_v58 }
 0x326   :  { %849 = vrsqrt.f32 %v354_v59 }
 0x333   :  { %v850_v61 = vpop.eup %849 }
 0x334   :  { %v356_v63 = vmul.f32 %v850_v61, %v353_v60 }
 0x336   :  { %v361_v2 = vmul.f32 %v573_v62, %v356_v63 }
 0x338   :  { %v366_v3 = vadd.f32 %v574_v1, %v361_v2 }
 0x33a   :  { %851 = vtanh.f32 %v366_v3 }
 0x347   :  { %v852_v5 = vpop.eup %851 }
 0x348   :  { %v368_v6 = vadd.f32 %v852_v5, %v37_v4 }
 0x34a   :  { %800 = vmatmul.mubr.f32.vlgmr.msra.gmra.mxu1 %v368_v6 }
 0x40a   :  { %v455_v11 = vpop.f32.mrf.mxu1 }
 0x40b   :  { %v456_v12 = vadd.f32 %v575_v10, %v455_v11 }
 0x40c   :  { %v801_v13 = vpop.f32.mrf.mxu1 }
 0x40d   :  { %v459_v14 = vmax.f32 %v456_v12, 0.0 }
 0x40f   :  { %835 = vmatmul.mubr.f32.vlgmr.msra.gmra.mxu0 %v459_v14 }
 0x4cf   :  { %v546_v16 = vpop.f32.mrf.mxu0 }
 0x4d0   :  { %v547_v17 = vadd.f32 %v576_v15, %v546_v16 }
 0x4d1   :  { %v836_v18 = vpop.f32.mrf.mxu0 }
 0x4d2   :  { %551 = vst.msk [vmem:[#allocation5] sm:$0xff] %vm550_vm1, %v547_v17 }
 0x4d3   :  { %884 = shalt.err (!%p881_p9)
}
 0x4d4   :  { %561 = dma.vmem_to_hbm [thread:$0]  %s559_s19, 128, %s1024_s2, [#allocation4]  }
 0x4d5   :  { %895 = dma.done.wait [#allocation4], 128  }
 0x4d6   :  { %896 = vsyncadd [#allocation4], 4294967168 }
 0x4d7   :  { %565 = vsyncpa [#allocation3], 1 }
 0x4d8   :  { %566 = vsyncpa [#allocation4], 1 }

</bundles_post_ra>
